<compile_context>
chip_gen: v5e
topology: v5e:2x2
jax: 0.10.0
libtpu: 0.0.40
codegen_flags: <defaults>
</compile_context>

<pallas_src>
import jax
import jax.numpy as jnp
from jax.experimental import pallas as pl
from jax.experimental.pallas import tpu as pltpu


def _round_up(n, m):
    return ((n + m - 1) // m) * m


def mlp_kernel(x_ref, w1_ref, b1_ref, w2_ref, b2_ref, w3_ref, b3_ref, o_ref):
    # Linear 1 (bf16 x bf16 -> f32 acc) + bias + ReLU, back to bf16 for MXU.
    h = jnp.dot(x_ref[...], w1_ref[...], preferred_element_type=jnp.float32)
    h = jnp.maximum(h + b1_ref[...], 0.0).astype(jnp.bfloat16)
    # Linear 2 + ReLU
    h = jnp.dot(h, w2_ref[...], preferred_element_type=jnp.float32)
    h = jnp.maximum(h + b2_ref[...], 0.0).astype(jnp.bfloat16)
    # Linear 3 (no activation), f32 output
    out = jnp.dot(h, w3_ref[...], preferred_element_type=jnp.float32) + b3_ref[...]
    o_ref[...] = out.astype(o_ref.dtype)


def mlp_pallas(feats, params, *, tile_b=128):
    """feats: (B, F) float32.  params: padded, bf16 weights / f32 biases."""
    B, F = feats.shape
    w1, b1 = params["w1"], params["b1"]   # (F, H1p) bf16, (1, H1p) f32
    w2, b2 = params["w2"], params["b2"]   # (H1p, H2p) bf16, (1, H2p) f32
    w3, b3 = params["w3"], params["b3"]   # (H2p, latent) bf16, (1, latent) f32
    H1p, H2p = w1.shape[1], w2.shape[1]
    latent = w3.shape[1]

    # Big lane/sublane-aligned batch tile; keep a multiple of 8.
    tile_b = min(tile_b, _round_up(B, 8))
    grid = (pl.cdiv(B, tile_b),)

    feats_bf16 = feats.astype(jnp.bfloat16)

    def replicated(shape):
        # Full array, same block for every batch tile -> DMA'd once.
        return pl.BlockSpec(shape, lambda i: tuple(0 for _ in shape))

    flops = 2 * B * (F * H1p + H1p * H2p + H2p * latent)
    bytes_accessed = (
        feats_bf16.size * 2
        + (w1.size + w2.size + w3.size) * 2
        + (b1.size + b2.size + b3.size) * 4
        + B * latent * 4
    )

    return pl.pallas_call(
        mlp_kernel,
        out_shape=jax.ShapeDtypeStruct((B, latent), jnp.float32),
        grid_spec=pltpu.PrefetchScalarGridSpec(
            num_scalar_prefetch=0,
            grid=grid,
            in_specs=[
                pl.BlockSpec((tile_b, F), lambda i: (i, 0)),
                replicated(w1.shape),
                replicated(b1.shape),
                replicated(w2.shape),
                replicated(b2.shape),
                replicated(w3.shape),
                replicated(b3.shape),
            ],
            out_specs=pl.BlockSpec((tile_b, latent), lambda i: (i, 0)),
        ),
        compiler_params=pltpu.CompilerParams(
            dimension_semantics=("parallel",),
        ),
        cost_estimate=pl.CostEstimate(
            flops=int(flops), transcendentals=0, bytes_accessed=int(bytes_accessed)
        ),
    )(feats_bf16, w1, b1, w2, b2, w3, b3)


def init_params(key, feature_dim, latent_dim):
    """Deterministic init mirroring nn.Linear default (uniform +-1/sqrt(fan_in)),
    stored transposed as (in, out), unpadded float32 (the reference params)."""
    dims = [(feature_dim, feature_dim // 2),
            (feature_dim // 2, feature_dim // 4),
            (feature_dim // 4, latent_dim)]
    params = {}
    for idx, (fan_in, fan_out) in enumerate(dims, start=1):
        key, kw, kb = jax.random.split(key, 3)
        bound = 1.0 / jnp.sqrt(fan_in)
        params[f"w{idx}"] = jax.random.uniform(
            kw, (fan_in, fan_out), jnp.float32, -bound, bound)
        params[f"b{idx}"] = jax.random.uniform(
            kb, (1, fan_out), jnp.float32, -bound, bound)
    return params


def prepare_params(params, lane=128):
    """Zero-pad hidden dims up to lane width and cast weights to bf16.

    Padding is exact: padded layer-1/2 columns get zero weights AND zero bias,
    so ReLU(0)=0, and the matching padded rows of the next weight are zero.
    """
    w1, b1 = params["w1"], params["b1"]
    w2, b2 = params["w2"], params["b2"]
    w3, b3 = params["w3"], params["b3"]
    F, H1 = w1.shape
    H2 = w2.shape[1]
    L = w3.shape[1]
    H1p, H2p = _round_up(H1, lane), _round_up(H2, lane)

    w1p = jnp.zeros((F, H1p), jnp.float32).at[:, :H1].set(w1)
    b1p = jnp.zeros((1, H1p), jnp.float32).at[:, :H1].set(b1)
    w2p = jnp.zeros((H1p, H2p), jnp.float32).at[:H1, :H2].set(w2)
    b2p = jnp.zeros((1, H2p), jnp.float32).at[:, :H2].set(b2)
    w3p = jnp.zeros((H2p, L), jnp.float32).at[:H2, :].set(w3)

    return {
        "w1": w1p.astype(jnp.bfloat16), "b1": b1p,
        "w2": w2p.astype(jnp.bfloat16), "b2": b2p,
        "w3": w3p.astype(jnp.bfloat16), "b3": b3,
    }


def extractor_get_embedding(x):
    # Synthetic extractor: flatten NCHW -> (B, C*H*W) = (B, feature_dim).
    B = x.shape[0]
    return x.reshape(B, -1)


def mlp_forward(x, prepared_params):
    feats = extractor_get_embedding(x)          # glue (plain JAX)
    return mlp_pallas(feats, prepared_params)   # hot path (Pallas kernel)


if __name__ == "__main__":
    key = jax.random.PRNGKey(0)
    kx, kp = jax.random.split(key)

    # feature_dim = C*H*W = 256, latent = 128.  Batch 256 with tile_b=128 gives
    # a 2-step "parallel" grid (keeps both v7x TensorCores busy).
    B, C, H, W = 256, 4, 8, 8
    feature_dim = C * H * W
    latent_dim = 128

    x = jax.random.normal(kx, (B, C, H, W), jnp.float32)
    params = init_params(kp, feature_dim, latent_dim)
    prepared = prepare_params(params)

    out = mlp_forward(x, prepared)
    out = jax.block_until_ready(out)

    # Pure-JAX f32 reference with the unpadded params (bf16 kernel -> relaxed tol).
    feats = extractor_get_embedding(x)
    h = jnp.maximum(feats @ params["w1"] + params["b1"], 0.0)
    h = jnp.maximum(h @ params["w2"] + params["b2"], 0.0)
    ref = h @ params["w3"] + params["b3"]

    assert out.shape == (B, latent_dim)
    assert jnp.allclose(out, ref, atol=5e-2, rtol=5e-2), (
        float(jnp.max(jnp.abs(out - ref))))

    print("KERNEL_OK")
</pallas_src>

<mosaic_0001>
module attributes {stable_mosaic.version = 11 : i64} {
  func.func @mlp_kernel(%arg0: i32, %arg1: memref<128x256xbf16, #tpu.memory_space<vmem>>, %arg2: memref<256x128xbf16, #tpu.memory_space<vmem>>, %arg3: memref<1x128xf32, #tpu.memory_space<vmem>>, %arg4: memref<128x128xbf16, #tpu.memory_space<vmem>>, %arg5: memref<1x128xf32, #tpu.memory_space<vmem>>, %arg6: memref<128x128xbf16, #tpu.memory_space<vmem>>, %arg7: memref<1x128xf32, #tpu.memory_space<vmem>>, %arg8: memref<128x128xf32, #tpu.memory_space<vmem>>) attributes {dimension_semantics = [#tpu.dimension_semantics<parallel>], iteration_bounds = array<i64: 2>, scalar_prefetch = 0 : i64, scratch_operands = 0 : i64, tpu.core_type = #tpu.core_type<tc>, window_params = [{transform_indices = @transform_0, window_bounds = array<i64: 128, 256>}, {pipeline_mode = #tpu.pipeline_mode<synchronous>, transform_indices = @transform_1, window_bounds = array<i64: 256, 128>}, {pipeline_mode = #tpu.pipeline_mode<synchronous>, transform_indices = @transform_2, window_bounds = array<i64: 1, 128>}, {pipeline_mode = #tpu.pipeline_mode<synchronous>, transform_indices = @transform_3, window_bounds = array<i64: 128, 128>}, {pipeline_mode = #tpu.pipeline_mode<synchronous>, transform_indices = @transform_4, window_bounds = array<i64: 1, 128>}, {pipeline_mode = #tpu.pipeline_mode<synchronous>, transform_indices = @transform_5, window_bounds = array<i64: 128, 128>}, {pipeline_mode = #tpu.pipeline_mode<synchronous>, transform_indices = @transform_6, window_bounds = array<i64: 1, 128>}, {transform_indices = @transform_7, window_bounds = array<i64: 128, 128>}]} {
    %c0 = arith.constant 0 : index
    %c0_0 = arith.constant 0 : index
    %0 = vector.load %arg1[%c0, %c0_0] : memref<128x256xbf16, #tpu.memory_space<vmem>>, vector<128x256xbf16>
    %c0_1 = arith.constant 0 : index
    %c0_2 = arith.constant 0 : index
    %1 = vector.load %arg2[%c0_1, %c0_2] : memref<256x128xbf16, #tpu.memory_space<vmem>>, vector<256x128xbf16>
    %cst = arith.constant dense<0.000000e+00> : vector<128x128xf32>
    %2 = tpu.matmul %0, %1, %cst {dimension_numbers = #tpu.dot_dimension_numbers<[1], [0], [0], [1], [0, 0, 1, 1], [], []>} : vector<128x256xbf16>, vector<256x128xbf16>, vector<128x128xf32> -> vector<128x128xf32>
    %c0_3 = arith.constant 0 : index
    %c0_4 = arith.constant 0 : index
    %3 = vector.load %arg3[%c0_3, %c0_4] : memref<1x128xf32, #tpu.memory_space<vmem>>, vector<1x128xf32>
    %4 = vector.broadcast %3 : vector<1x128xf32> to vector<128x128xf32>
    %5 = arith.addf %2, %4 : vector<128x128xf32>
    %cst_5 = arith.constant 0.000000e+00 : f32
    %6 = vector.broadcast %cst_5 : f32 to vector<128x128xf32>
    %7 = arith.maximumf %5, %6 : vector<128x128xf32>
    %8 = arith.truncf %7 : vector<128x128xf32> to vector<128x128xbf16>
    %c0_6 = arith.constant 0 : index
    %c0_7 = arith.constant 0 : index
    %9 = vector.load %arg4[%c0_6, %c0_7] : memref<128x128xbf16, #tpu.memory_space<vmem>>, vector<128x128xbf16>
    %cst_8 = arith.constant dense<0.000000e+00> : vector<128x128xf32>
    %10 = tpu.matmul %8, %9, %cst_8 {dimension_numbers = #tpu.dot_dimension_numbers<[1], [0], [0], [1], [0, 0, 1, 1], [], []>} : vector<128x128xbf16>, vector<128x128xbf16>, vector<128x128xf32> -> vector<128x128xf32>
    %c0_9 = arith.constant 0 : index
    %c0_10 = arith.constant 0 : index
    %11 = vector.load %arg5[%c0_9, %c0_10] : memref<1x128xf32, #tpu.memory_space<vmem>>, vector<1x128xf32>
    %12 = vector.broadcast %11 : vector<1x128xf32> to vector<128x128xf32>
    %13 = arith.addf %10, %12 : vector<128x128xf32>
    %cst_11 = arith.constant 0.000000e+00 : f32
    %14 = vector.broadcast %cst_11 : f32 to vector<128x128xf32>
    %15 = arith.maximumf %13, %14 : vector<128x128xf32>
    %16 = arith.truncf %15 : vector<128x128xf32> to vector<128x128xbf16>
    %c0_12 = arith.constant 0 : index
    %c0_13 = arith.constant 0 : index
    %17 = vector.load %arg6[%c0_12, %c0_13] : memref<128x128xbf16, #tpu.memory_space<vmem>>, vector<128x128xbf16>
    %cst_14 = arith.constant dense<0.000000e+00> : vector<128x128xf32>
    %18 = tpu.matmul %16, %17, %cst_14 {dimension_numbers = #tpu.dot_dimension_numbers<[1], [0], [0], [1], [0, 0, 1, 1], [], []>} : vector<128x128xbf16>, vector<128x128xbf16>, vector<128x128xf32> -> vector<128x128xf32>
    %c0_15 = arith.constant 0 : index
    %c0_16 = arith.constant 0 : index
    %19 = vector.load %arg7[%c0_15, %c0_16] : memref<1x128xf32, #tpu.memory_space<vmem>>, vector<1x128xf32>
    %20 = vector.broadcast %19 : vector<1x128xf32> to vector<128x128xf32>
    %21 = arith.addf %18, %20 : vector<128x128xf32>
    %c0_17 = arith.constant 0 : index
    %c0_18 = arith.constant 0 : index
    %22 = vector.load %arg8[%c0_17, %c0_18] : memref<128x128xf32, #tpu.memory_space<vmem>>, vector<128x128xf32>
    tpu.vector_store %arg8[%c0_17, %c0_18], %21 {strides = array<i32>} : memref<128x128xf32, #tpu.memory_space<vmem>>, vector<128x128xf32>,
    return
  }
  func.func @transform_0(%arg0: i32) -> (i32, i32) {
    %c0_i32 = arith.constant 0 : i32
    %c0_i32_0 = arith.constant 0 : i32
    return %arg0, %c0_i32 : i32, i32
  }
  func.func @transform_1(%arg0: i32) -> (i32, i32) {
    %c0_i32 = arith.constant 0 : i32
    %c0_i32_0 = arith.constant 0 : i32
    %c0_i32_1 = arith.constant 0 : i32
    return %c0_i32, %c0_i32_0 : i32, i32
  }
  func.func @transform_2(%arg0: i32) -> (i32, i32) {
    %c0_i32 = arith.constant 0 : i32
    %c0_i32_0 = arith.constant 0 : i32
    %c0_i32_1 = arith.constant 0 : i32
    return %c0_i32, %c0_i32_0 : i32, i32
  }
  func.func @transform_3(%arg0: i32) -> (i32, i32) {
    %c0_i32 = arith.constant 0 : i32
    %c0_i32_0 = arith.constant 0 : i32
    %c0_i32_1 = arith.constant 0 : i32
    return %c0_i32, %c0_i32_0 : i32, i32
  }
  func.func @transform_4(%arg0: i32) -> (i32, i32) {
    %c0_i32 = arith.constant 0 : i32
    %c0_i32_0 = arith.constant 0 : i32
    %c0_i32_1 = arith.constant 0 : i32
    return %c0_i32, %c0_i32_0 : i32, i32
  }
  func.func @transform_5(%arg0: i32) -> (i32, i32) {
    %c0_i32 = arith.constant 0 : i32
    %c0_i32_0 = arith.constant 0 : i32
    %c0_i32_1 = arith.constant 0 : i32
    return %c0_i32, %c0_i32_0 : i32, i32
  }
  func.func @transform_6(%arg0: i32) -> (i32, i32) {
    %c0_i32 = arith.constant 0 : i32
    %c0_i32_0 = arith.constant 0 : i32
    %c0_i32_1 = arith.constant 0 : i32
    return %c0_i32, %c0_i32_0 : i32, i32
  }
  func.func @transform_7(%arg0: i32) -> (i32, i32) {
    %c0_i32 = arith.constant 0 : i32
    %c0_i32_0 = arith.constant 0 : i32
    return %arg0, %c0_i32 : i32, i32
  }
}

</mosaic_0001>

<bundles_post_ra>
// kernel: tpu_custom_call.1
= control target key start
LH: loop header
LB: loop body
LE: loop exit
PB: predicated region body
PF: predicated region fallthrough
CT: control target
= control target key end

     0   :  { %s1933_s0 = inlined_call_operand.hbm [shape: bf16[256,256], index: 0, kind: input, shape index: {}]   ;;  %s1934_s1 = inlined_call_operand.hbm [shape: bf16[256,128], index: 1, kind: input, shape index: {}]   ;;  %s1935_s2 = inlined_call_operand.vmem [shape: f32[1,128], index: 2, kind: input, shape index: {}]   ;;  %s1936_s3 = inlined_call_operand.hbm [shape: bf16[128,128], index: 3, kind: input, shape index: {}]   ;;  %s1937_s4 = inlined_call_operand.vmem [shape: f32[1,128], index: 4, kind: input, shape index: {}]   ;;  %s1938_s5 = inlined_call_operand.hbm [shape: bf16[128,128], index: 5, kind: input, shape index: {}]   ;;  %s1939_s6 = inlined_call_operand.vmem [shape: f32[1,128], index: 6, kind: input, shape index: {}]   ;;  %s1940_s7 = inlined_call_operand.hbm [shape: f32[256,128], index: 7, kind: output, shape index: {}]  }
   0x1   :  { %1941 = sst [smem:[#allocation15_spill]] %s1934_s1 }
   0x2   :  { %12 = vsyncpa [#allocation3], 0 }
   0x3   :  { %14 = vsyncpa [#allocation3 + $0x1], 0 }
   0x4   :  { %15 = vsyncpa [#allocation6], 0 }
   0x5   :  { %16 = vsyncpa [#allocation9], 0 }
   0x6   :  { %17 = vsyncpa [#allocation4], 0 }
   0x7   :  { %19 = vsyncpa [#allocation4 + $0x1], 0  ;;  %s1689_s24 = smov 0   ;;  %s1691_s25 = smov 0  }
   0x8   :  { %s1693_s26 = smov 0   ;;  %s1695_s27 = smov 0  }
   0x9 LB: > { %s1710_s28 = sadd.s32 4294967295, %s1638_s27   ;;  %s1094_s29 = sadd.s32 4294967294, %s1638_s27   ;;  %s1638_s27 = sphi %s1695_s27, %s1953_s27   ;;  %s1634_s26 = sphi %s1693_s26, %s1952_s26   ;;  %s1630_s25 = sphi %s1691_s25, %s1951_s25   ;;  %s1626_s24 = sphi %s1689_s24, %s1950_s24  }
   0xa   : > { %p45_p0 = scmp.ne.s32.totalorder %s1630_s25, %s1626_s24  ;;  %p46_p1 = scmp.eq.s32.totalorder %s1710_s28, 0 }
   0xb   : > { %p195_p2 = scmp.eq.s32.totalorder %s1710_s28, 1  ;;  %p201_p3 = scmp.eq.s32.totalorder %s1094_s29, 1 }
   0xc   : > { %p1719_p4 = por %p46_p1, %p45_p0  ;;  %p1095_p5 = scmp.ge.s32.totalorder %s1638_s27, 1 }
   0xd   : > { %p1724_p6 = por %p201_p3, %p45_p0  ;;  %p208_p7 = scmp.lt.s32.totalorder %s1638_s27, 3 }
   0xe   : > { %s1944_s1 = sld [smem:[#allocation15_spill]]  ;;  %s1640_s13 = smov [#allocation5]  }
   0xf   : > { %p1732_p8 = pnand %p1095_p5, %p208_p7  ;;  %s221_s14 = sshll.u32 %s1640_s13, 4  ;;  %s222_s14 = int_to_ptr.vmem [resolvable:$true] %s221_s14 }
  0x10   : > { %s236_s18 = sshll.u32 %s1936_s3, 4  ;;  %s1641_s19 = smov 64   ;;  %s237_s18 = int_to_ptr.hbm [resolvable:$true] %s236_s18 }
  0x11   : > { %p1374_p9 = pneg %p1732_p8  ;;  %s1642_s20 = smov 4  }
  0x12   : > { %s1643_s21 = smov [#allocation7]   ;;  %s253_s9 = sshll.u32 %s1938_s5, 4  ;;  %s254_s9 = int_to_ptr.hbm [resolvable:$true] %s253_s9 }
  0x13   : > { %p1740_p10 = pnand %p1374_p9, %p46_p1  ;;  %s238_s22 = sshll.u32 %s1643_s21, 4  ;;  %s239_s22 = int_to_ptr.vmem [resolvable:$true] %s238_s22 }
  0x14   : > { %s219_s11 = sshll.u32 %s1944_s1, 4  ;;  %s1644_s10 = smov [#allocation8]   ;;  %s220_s11 = int_to_ptr.hbm [resolvable:$true] %s219_s11 }
  0x15   : > { %1377 = dma.hbm_to_vmem [thread:$0]  (!%p1740_p10), %s220_s11, 2048, %s222_s14, [#allocation6], %s1641_s19, %s1641_s19, %s1642_s20  }
  0x16   : > { %1380 = dma.hbm_to_vmem [thread:$0]  (!%p1740_p10), %s237_s18, 1024, %s239_s22, [#allocation6], %s1641_s19, %s1641_s19, %s1642_s20  }
  0x17   : > { %s255_s13 = sshll.u32 %s1644_s10, 4  ;;  %s1756_s11 = sadd.s32 1, %s1638_s27   ;;  %s256_s13 = int_to_ptr.vmem [resolvable:$true] %s255_s13 }
  0x18   : > { %1383 = dma.hbm_to_vmem [thread:$0]  (!%p1740_p10), %s254_s9, 1024, %s256_s13, [#allocation9], %s1641_s19, %s1641_s19, %s1642_s20  }
  0x19   : > { %s29_s14 = ssub.s32 %s1638_s27, %s1756_s11  ;;  %s32_s16 = sadd.s32 1, %s1634_s26 }
  0x1a   : > { %p30_p12 = scmp.eq.s32.totalorder %s29_s14, 0  ;;  %p39_p13 = scmp.ne.s32.totalorder %s1634_s26, %s1630_s25 }
  0x1b   : > { %p40_p0 = scmp.eq.s32.totalorder %s1638_s27, 0  ;;  %p1395_p3 = scmp.lt.s32.totalorder %s1638_s27, 2 }
  0x1c   : > { %s1768_s17 = scalar_select %p30_p12, %s1634_s26, %s32_s16  }
  0x1d   : > { %p41_p5 = por %p40_p0, %p39_p13  ;;  %p1772_p7 = por %p195_p2, %p39_p13 }
  0x1e   : > { %s272_s21 = sand.u32 1, %s1634_s26   ;;  %s1308_s22 = sshll.u32 %s1638_s27, 7 }
  0x1f   : > { %s1100_s15 = sshll.u32 %s272_s21, 7  ;;  %s282_s20 = scalar_lea.hbm %s1933_s0, %s1308_s22 }
  0x20   : > { %s283_s29 = sshll.u32 %s282_s20, 4  ;;  %s276_s9 = scalar_lea.vmem [#allocation2], %s1100_s15  ;;  %s284_s29 = int_to_ptr.hbm [resolvable:$true] %s283_s29 }
  0x21   : > { %s285_s10 = sshll.u32 %s276_s9, 4  ;;  %p1783_p9 = pnand %p1395_p3, %p41_p5  ;;  %s286_s10 = int_to_ptr.vmem [resolvable:$true] %s285_s10 }
  0x22   : > { %s273_s14 = scalar_lea.sflag [#allocation3], %s272_s21  ;;  %s1534_s16 = sshra.s32 %s284_s29, 4  ;;  %s1535_s16 = int_to_ptr.hbm [resolvable:$true] %s1534_s16 }
  0x23   : > { %s1536_s1 = scalar_lea.hbm %s1535_s16, 128  ;;  %p1538_p10 = pneg %p1783_p9 }
  0x24   : > { %p1537_p2 = scmp.ne.s32.totalorder %s1535_s16, %s1536_s1  ;;  %s1541_s23 = scalar_lea.hbm %s1933_s0, 256 }
  0x25   : > { %p1542_p0 = scmp.lt.s32.totalorder %s1535_s16, %s1933_s0  ;;  %p1543_p3 = scmp.lt.s32.totalorder %s1541_s23, %s1536_s1 }
  0x26   : > { %p1539_p12 = pnand %p1538_p10, %p1537_p2 }
  0x27   : > { %p1544_p5 = por %p1543_p3, %p1542_p0 }
  0x28   : > { %p1540_p13 = pneg %p1539_p12 }
  0x2a   : > { %p1545_p11 = pnand %p1544_p5, %p1540_p13 }
  0x2c   : > { %1548 = shalt.err (!%p1545_p11)
}
  0x2d   : > { %s1645_s21 = smov 128   ;;  %s1646_s9 = smov 8  }
  0x2e   : > { %1387 = dma.hbm_to_vmem [thread:$0]  (!%p1783_p9), %s284_s29, 2048, %s286_s10, %s273_s14, %s1645_s21, %s1645_s21, %s1646_s9  }
  0x2f   : > { %297 = sbr.rel (%p1732_p8) target bundleno = 635 (0x27b), region = 48  ;;  %s1800_s22 = sand.u32 (!%p1732_p8), 1, %s1630_s25  }
  0x30   : > { %s1105_s16 = sshll.u32 (!%p1732_p8), %s1800_s22, 7  ;;  %s300_s1 = scalar_lea.sflag (!%p1732_p8), [#allocation3], %s1800_s22 }
  0x31   : > { %s1806_s15 = scalar_lea.vmem (!%p1732_p8), [#allocation2], %s1105_s16 }
  0x34   : > { %1609 = dma.done.wait (%p1719_p4), %s300_s1, 2048  }
  0x35   : > { %1611 = vsyncadd (%p1719_p4), %s300_s1, 4294965248 }
  0x36   : > { %1613 = dma.done.wait (%p46_p1), [#allocation6], 3072  }
  0x37   : > { %1615 = vsyncadd (%p46_p1), [#allocation6], 4294964224 }
  0x38   : > { %1617 = dma.done.wait (%p46_p1), [#allocation9], 1024  }
  0x39   : > { %1619 = vsyncadd (%p46_p1), [#allocation9], 4294966272  ;;  %v1332_v0 = vld [vmem:[#allocation5 + $0x38] sm:$0xff]  ;;  %v1331_v2 = vld [vmem:[#allocation5 + $0x30] sm:$0xff]  ;;  %s1881_s23 = scalar_lea.vmem [#allocation10], %s1105_s16  ;;  %s1357_s19 = sshll.u32 %s1710_s28, 7 }
  0x3a   : > { %v1340_v1 = vld [vmem:[#allocation5 + $0x78] sm:$0xff]  ;;  %580 = vmatpush.bf16.msra.mxu0 %v1332_v0  ;;  %v1339_v3 = vld [vmem:[#allocation5 + $0x70] sm:$0xff]  ;;  %v1330_v4 = vld [vmem:[#allocation5 + $0x28] sm:$0xff]  ;;  %s988_s9 = scalar_lea.hbm %s1940_s7, %s1357_s19  ;;  %s989_s16 = sshll.u32 %s1881_s23, 4  ;;  %s990_s16 = int_to_ptr.vmem [resolvable:$true] %s989_s16 }
  0x3b   : > { %629 = vmatpush.bf16.msra.mxu1 %v1340_v1  ;;  %v1338_v5 = vld [vmem:[#allocation5 + $0x68] sm:$0xff]  ;;  %v1329_v6 = vld [vmem:[#allocation5 + $0x20] sm:$0xff]  ;;  %v1328_v8 = vld [vmem:[#allocation5 + $0x18] sm:$0xff]  ;;  %s991_s1 = sshll.u32 %s988_s9, 4  ;;  %s1584_s10 = scalar_lea.hbm %s1940_s7, 256  ;;  %s992_s1 = int_to_ptr.hbm [resolvable:$true] %s991_s1 }
  0x3c   : > { %v1337_v7 = vld [vmem:[#allocation5 + $0x60] sm:$0xff]  ;;  %v1336_v9 = vld [vmem:[#allocation5 + $0x58] sm:$0xff]  ;;  %v1327_v10 = vld [vmem:[#allocation5 + $0x10] sm:$0xff]  ;;  %s1578_s30 = sshra.s32 %s992_s1, 4  ;;  %s1579_s30 = int_to_ptr.hbm [resolvable:$true] %s1578_s30 }
  0x3d   : > { %v1335_v11 = vld [vmem:[#allocation5 + $0x50] sm:$0xff]  ;;  %v1326_v12 = vld [vmem:[#allocation5 + $0x8] sm:$0xff]  ;;  %v1325_v14 = vld [vmem:[#allocation5] sm:$0xff]  ;;  %s1580_s12 = scalar_lea.hbm %s1579_s30, 128  ;;  %p1585_p11 = scmp.lt.s32.totalorder %s1579_s30, %s1940_s7 }
  0x3e   : > { %581 = vmatpush.bf16.msra.mxu0 %v1331_v2  ;;  %v1334_v13 = vld [vmem:[#allocation5 + $0x48] sm:$0xff]  ;;  %v1333_v15 = vld [vmem:[#allocation5 + $0x40] sm:$0xff]  ;;  %v1120_v22 = vld [vmem:[%s1806_s15 + $0x10] sm:$0xf]  ;;  %p1581_p1 = scmp.ne.s32.totalorder %s1579_s30, %s1580_s12  ;;  %p1586_p9 = scmp.lt.s32.totalorder %s1584_s10, %s1580_s12 }
  0x3f   : > { %630 = vmatpush.bf16.msra.mxu1 %v1339_v3  ;;  %v1112_v16 = vld [vmem:[%s1806_s15] sm:$0xf]  ;;  %v1310_v17 = vld [vmem:[%s1806_s15 + $0x4] sm:$0xf0]  ;;  %v1309_v18 = vld [vmem:[%s1806_s15 + $0x4] sm:$0xf] }
  0x40   : > { %v1114_v19 = vld [vmem:[%s1806_s15 + $0x8] sm:$0xf0]  ;;  %v1113_v20 = vor.u32 %v1310_v17, %v1112_v16  ;;  %v1312_v23 = vld [vmem:[%s1806_s15 + $0x14] sm:$0xf0]  ;;  %v1311_v24 = vld [vmem:[%s1806_s15 + $0x14] sm:$0xf]  ;;  %p1582_p4 = pnand %p1581_p1, %p1772_p7  ;;  %p1587_p2 = por %p1586_p9, %p1585_p11 }
  0x41   : > { %v1117_v21 = vor.u32 %v1309_v18, %v1114_v19  ;;  %v1122_v25 = vld [vmem:[%s1806_s15 + $0x18] sm:$0xf0]  ;;  %v1121_v26 = vor.u32 %v1312_v23, %v1120_v22  ;;  %v1128_v28 = vld [vmem:[%s1806_s15 + $0x20] sm:$0xf]  ;;  %v1314_v29 = vld [vmem:[%s1806_s15 + $0x24] sm:$0xf0] }
  0x42   : > { %582 = vmatpush.bf16.msra.mxu0 %v1330_v4  ;;  %v1125_v27 = vor.u32 %v1311_v24, %v1122_v25  ;;  %v1313_v30 = vld [vmem:[%s1806_s15 + $0x24] sm:$0xf]  ;;  %v1130_v31 = vld [vmem:[%s1806_s15 + $0x28] sm:$0xf0]  ;;  %v1129_v32 = vor.u32 %v1314_v29, %v1128_v28  ;;  %v1136_v34 = vld [vmem:[%s1806_s15 + $0x30] sm:$0xf]  ;;  %p1583_p8 = pneg %p1582_p4 }
  0x43   : > { %631 = vmatpush.bf16.msra.mxu1 %v1338_v5  ;;  %v1133_v33 = vor.u32 %v1313_v30, %v1130_v31  ;;  %v1316_v35 = vld [vmem:[%s1806_s15 + $0x34] sm:$0xf0]  ;;  %v1315_v36 = vld [vmem:[%s1806_s15 + $0x34] sm:$0xf]  ;;  %v1138_v37 = vld [vmem:[%s1806_s15 + $0x38] sm:$0xf0] }
  0x44   : > { %v1137_v38 = vor.u32 %v1316_v35, %v1136_v34  ;;  %v1141_v39 = vor.u32 %v1315_v36, %v1138_v37  ;;  %v1144_v40 = vld [vmem:[%s1806_s15 + $0x40] sm:$0xf]  ;;  %v1318_v41 = vld [vmem:[%s1806_s15 + $0x44] sm:$0xf0]  ;;  %v1317_v42 = vld [vmem:[%s1806_s15 + $0x44] sm:$0xf]  ;;  %p1588_p10 = pnand %p1587_p2, %p1583_p8 }
  0x45   : > { %v1146_v43 = vld [vmem:[%s1806_s15 + $0x48] sm:$0xf0]  ;;  %v1145_v44 = vor.u32 %v1318_v41, %v1144_v40  ;;  %v1348_v46 = vld [vmem:[#allocation7 + $0x38] sm:$0xff]  ;;  %v1152_v47 = vld [vmem:[%s1806_s15 + $0x50] sm:$0xf] }
  0x46   : > { %583 = vmatpush.bf16.msra.mxu0 %v1329_v6  ;;  %v1149_v45 = vor.u32 %v1317_v42, %v1146_v43  ;;  %770 = vmatpush.bf16.msra.mxu2 %v1348_v46  ;;  %v1320_v48 = vld [vmem:[%s1806_s15 + $0x54] sm:$0xf0]  ;;  %v1319_v49 = vld [vmem:[%s1806_s15 + $0x54] sm:$0xf]  ;;  %v1154_v50 = vld [vmem:[%s1806_s15 + $0x58] sm:$0xf0] }
  0x47   : > { %632 = vmatpush.bf16.msra.mxu1 %v1337_v7  ;;  %v1153_v51 = vor.u32 %v1320_v48, %v1152_v47  ;;  %v1157_v52 = vor.u32 %v1319_v49, %v1154_v50  ;;  %v1347_v53 = vld [vmem:[#allocation7 + $0x30] sm:$0xff]  ;;  %v1346_v54 = vld [vmem:[#allocation7 + $0x28] sm:$0xff]  ;;  %v1345_v55 = vld [vmem:[#allocation7 + $0x20] sm:$0xff] }
  0x48   : > { %v1160_v56 = vld [vmem:[%s1806_s15 + $0x60] sm:$0xf]  ;;  %v1322_v57 = vld [vmem:[%s1806_s15 + $0x64] sm:$0xf0]  ;;  %v1321_v58 = vld [vmem:[%s1806_s15 + $0x64] sm:$0xf] }
  0x49   : > { %v1162_v59 = vld [vmem:[%s1806_s15 + $0x68] sm:$0xf0]  ;;  %v1161_v60 = vor.u32 %v1322_v57, %v1160_v56  ;;  %v1344_v62 = vld [vmem:[#allocation7 + $0x18] sm:$0xff]  ;;  %v1343_v63 = vld [vmem:[#allocation7 + $0x10] sm:$0xff] }
  0x4a   : > { %584 = vmatpush.bf16.msra.mxu0 %v1328_v8  ;;  %771 = vmatpush.bf16.msra.mxu2 %v1347_v53  ;;  %v1165_v61 = vor.u32 %v1321_v58, %v1162_v59  ;;  %v1342_v0 = vld [vmem:[#allocation7 + $0x8] sm:$0xff]  ;;  %v1168_v1 = vld [vmem:[%s1806_s15 + $0x70] sm:$0xf]  ;;  %v1324_v2 = vld [vmem:[%s1806_s15 + $0x74] sm:$0xf0] }
  0x4b   : > { %633 = vmatpush.bf16.msra.mxu1 %v1336_v9  ;;  %v1323_v3 = vld [vmem:[%s1806_s15 + $0x74] sm:$0xf]  ;;  %v1170_v4 = vld [vmem:[%s1806_s15 + $0x78] sm:$0xf0]  ;;  %v1341_v5 = vld [vmem:[#allocation7] sm:$0xff]  ;;  %v1169_v6 = vor.u32 %v1324_v2, %v1168_v1  ;;  %s977_s15 = scalar_lea.sflag [#allocation4], %s1800_s22 }
  0x4c   : > { %v1173_v7 = vor.u32 %v1323_v3, %v1170_v4 }
  0x4e   : > { %585 = vmatpush.bf16.msra.mxu0 %v1327_v10  ;;  %772 = vmatpush.bf16.msra.mxu2 %v1346_v54  ;;  %v1855_v10 = vld [vmem:[%s1935_s2] ss:$0 sm:$0xff] }
  0x4f   : > { %634 = vmatpush.bf16.msra.mxu1 %v1335_v11 }
  0x52   : > { %586 = vmatpush.bf16.msra.mxu0 %v1326_v12  ;;  %773 = vmatpush.bf16.msra.mxu2 %v1345_v55 }
  0x53   : > { %635 = vmatpush.bf16.msra.mxu1 %v1334_v13 }
  0x56   : > { %587 = vmatpush.bf16.msra.mxu0 %v1325_v14  ;;  %774 = vmatpush.bf16.msra.mxu2 %v1344_v62 }
  0x57   : > { %636 = vmatpush.bf16.msra.mxu1 %v1333_v15 }
  0x59   : > { %588 = vmatmul.bf16.vlgmr.msra.gmra.mxu0 %v1113_v20 }
  0x5a   : > { %637 = vmatmul.bf16.vlgmr.msra.gmra.mxu1 %v1117_v21  ;;  %775 = vmatpush.bf16.msra.mxu2 %v1343_v63 }
  0x5e   : > { %776 = vmatpush.bf16.msra.mxu2 %v1342_v0 }
  0x62   : > { %777 = vmatpush.bf16.msra.mxu2 %v1341_v5 }
  0x69   : > { %593 = vmatmul.bf16.gmra.mxu0 %v1121_v26 }
  0x6a   : > { %642 = vmatmul.bf16.gmra.mxu1 %v1125_v27 }
  0x79   : > { %598 = vmatmul.bf16.gmra.mxu0 %v1129_v32 }
  0x7a   : > { %647 = vmatmul.bf16.gmra.mxu1 %v1133_v33 }
  0x89   : > { %603 = vmatmul.bf16.gmra.mxu0 %v1137_v38 }
  0x8a   : > { %652 = vmatmul.bf16.gmra.mxu1 %v1141_v39 }
  0x99   : > { %608 = vmatmul.bf16.gmra.mxu0 %v1145_v44 }
  0x9a   : > { %657 = vmatmul.bf16.gmra.mxu1 %v1149_v45 }
  0xa9   : > { %613 = vmatmul.bf16.gmra.mxu0 %v1153_v51 }
  0xaa   : > { %662 = vmatmul.bf16.gmra.mxu1 %v1157_v52 }
  0xb9   : > { %618 = vmatmul.bf16.gmra.mxu0 %v1161_v60 }
  0xba   : > { %667 = vmatmul.bf16.gmra.mxu1 %v1165_v61 }
  0xc9   : > { %623 = vmatmul.bf16.gmra.mxu0 %v1169_v6 }
  0xca   : > { %672 = vmatmul.bf16.gmra.mxu1 %v1173_v7 }
  0xd6   : > { %v589_v8 = vpop.f32.mrf.mxu0 }
  0xd7   : > { %v638_v9 = vpop.f32.mrf.mxu1  ;;  %v590_v11 = vadd.f32 %v1855_v10, %v589_v8 }
  0xd9   : > { %v639_v14 = vadd.f32 %v638_v9, %v590_v11 }
  0xdb   : > { %v678_v17 = vmax.f32 %v639_v14, 0.0  ;;  %v1356_v14 = vld [vmem:[#allocation8 + $0x38] sm:$0xff] }
  0xdc   : > { %911 = vmatpush.bf16.msra.mxu3 %v1356_v14 }
  0xde   : > { %v591_v12 = vpop.f32.mrf.mxu0 }
  0xdf   : > { %v640_v13 = vpop.f32.mrf.mxu1  ;;  %v592_v15 = vadd.f32 %v1855_v10, %v591_v12 }
  0xe1   : > { %v641_v16 = vadd.f32 %v640_v13, %v592_v15  ;;  %v1355_v15 = vld [vmem:[#allocation8 + $0x30] sm:$0xff] }
  0xe2   : > { %912 = vmatpush.bf16.msra.mxu3 %v1355_v15 }
  0xe3   : > { %v679_v18 = vmax.f32 %v641_v16, 0.0 }
  0xe5   : > { %v694_v19 = vpack.c.bf16 %v679_v18, %v678_v17  ;;  %v1354_v17 = vld [vmem:[#allocation8 + $0x28] sm:$0xff] }
  0xe6   : > { %v594_v20 = vpop.f32.mrf.mxu0  ;;  %913 = vmatpush.bf16.msra.mxu3 %v1354_v17 }
  0xe7   : > { %v643_v21 = vpop.f32.mrf.mxu1  ;;  %778 = vmatmul.bf16.vlgmr.msra.gmra.mxu2 %v694_v19  ;;  %v595_v22 = vadd.f32 %v1855_v10, %v594_v20 }
  0xe9   : > { %v644_v25 = vadd.f32 %v643_v21, %v595_v22 }
  0xeb   : > { %v680_v28 = vmax.f32 %v644_v25, 0.0 }
  0xee   : > { %v596_v23 = vpop.f32.mrf.mxu0 }
  0xef   : > { %v645_v24 = vpop.f32.mrf.mxu1  ;;  %v597_v26 = vadd.f32 %v1855_v10, %v596_v23  ;;  %v1353_v23 = vld [vmem:[#allocation8 + $0x20] sm:$0xff] }
  0xf0   : > { %914 = vmatpush.bf16.msra.mxu3 %v1353_v23 }
  0xf1   : > { %v646_v27 = vadd.f32 %v645_v24, %v597_v26 }
  0xf3   : > { %v681_v29 = vmax.f32 %v646_v27, 0.0 }
  0xf5   : > { %v695_v30 = vpack.c.bf16 %v681_v29, %v680_v28  ;;  %v1352_v29 = vld [vmem:[#allocation8 + $0x18] sm:$0xff] }
  0xf6   : > { %v599_v31 = vpop.f32.mrf.mxu0  ;;  %915 = vmatpush.bf16.msra.mxu3 %v1352_v29 }
  0xf7   : > { %v648_v32 = vpop.f32.mrf.mxu1  ;;  %783 = vmatmul.bf16.gmra.mxu2 %v695_v30  ;;  %v600_v33 = vadd.f32 %v1855_v10, %v599_v31  ;;  %v1351_v31 = vld [vmem:[#allocation8 + $0x10] sm:$0xff] }
  0xf9   : > { %v649_v36 = vadd.f32 %v648_v32, %v600_v33 }
  0xfa   : > { %916 = vmatpush.bf16.msra.mxu3 %v1351_v31 }
  0xfb   : > { %v682_v39 = vmax.f32 %v649_v36, 0.0  ;;  %v1350_v36 = vld [vmem:[#allocation8 + $0x8] sm:$0xff] }
  0xfe   : > { %v601_v34 = vpop.f32.mrf.mxu0  ;;  %917 = vmatpush.bf16.msra.mxu3 %v1350_v36 }
  0xff   : > { %v650_v35 = vpop.f32.mrf.mxu1  ;;  %v602_v37 = vadd.f32 %v1855_v10, %v601_v34 }
 0x101   : > { %v651_v38 = vadd.f32 %v650_v35, %v602_v37 }
 0x103   : > { %v683_v40 = vmax.f32 %v651_v38, 0.0 }
 0x105   : > { %v696_v41 = vpack.c.bf16 %v683_v40, %v682_v39  ;;  %v1349_v40 = vld [vmem:[#allocation8] sm:$0xff] }
 0x106   : > { %v604_v42 = vpop.f32.mrf.mxu0  ;;  %918 = vmatpush.bf16.msra.mxu3 %v1349_v40 }
 0x107   : > { %v653_v43 = vpop.f32.mrf.mxu1  ;;  %788 = vmatmul.bf16.gmra.mxu2 %v696_v41  ;;  %v605_v44 = vadd.f32 %v1855_v10, %v604_v42 }
 0x109   : > { %v654_v47 = vadd.f32 %v653_v43, %v605_v44  ;;  %v1442_v43 = vld [vmem:[%s1937_s4] ss:$0 sm:$0xff] }
 0x10b   : > { %v684_v50 = vmax.f32 %v654_v47, 0.0 }
 0x10e   : > { %v606_v45 = vpop.f32.mrf.mxu0 }
 0x10f   : > { %v655_v46 = vpop.f32.mrf.mxu1  ;;  %v607_v48 = vadd.f32 %v1855_v10, %v606_v45 }
 0x111   : > { %v656_v49 = vadd.f32 %v655_v46, %v607_v48 }
 0x113   : > { %v685_v51 = vmax.f32 %v656_v49, 0.0 }
 0x115   : > { %v697_v52 = vpack.c.bf16 %v685_v51, %v684_v50 }
 0x116   : > { %v609_v53 = vpop.f32.mrf.mxu0 }
 0x117   : > { %v658_v54 = vpop.f32.mrf.mxu1  ;;  %793 = vmatmul.bf16.gmra.mxu2 %v697_v52  ;;  %v610_v55 = vadd.f32 %v1855_v10, %v609_v53 }
 0x119   : > { %v659_v58 = vadd.f32 %v658_v54, %v610_v55 }
 0x11b   : > { %v686_v61 = vmax.f32 %v659_v58, 0.0 }
 0x11e   : > { %v611_v56 = vpop.f32.mrf.mxu0 }
 0x11f   : > { %v660_v57 = vpop.f32.mrf.mxu1  ;;  %v612_v59 = vadd.f32 %v1855_v10, %v611_v56 }
 0x121   : > { %v661_v60 = vadd.f32 %v660_v57, %v612_v59 }
 0x123   : > { %v687_v62 = vmax.f32 %v661_v60, 0.0 }
 0x125   : > { %v698_v63 = vpack.c.bf16 %v687_v62, %v686_v61 }
 0x126   : > { %v614_v0 = vpop.f32.mrf.mxu0 }
 0x127   : > { %v663_v1 = vpop.f32.mrf.mxu1  ;;  %798 = vmatmul.bf16.gmra.mxu2 %v698_v63  ;;  %v615_v2 = vadd.f32 %v1855_v10, %v614_v0 }
 0x129   : > { %v664_v5 = vadd.f32 %v663_v1, %v615_v2 }
 0x12b   : > { %v688_v8 = vmax.f32 %v664_v5, 0.0 }
 0x12e   : > { %v616_v3 = vpop.f32.mrf.mxu0 }
 0x12f   : > { %v665_v4 = vpop.f32.mrf.mxu1  ;;  %v617_v6 = vadd.f32 %v1855_v10, %v616_v3 }
 0x131   : > { %v666_v7 = vadd.f32 %v665_v4, %v617_v6 }
 0x133   : > { %v689_v9 = vmax.f32 %v666_v7, 0.0 }
 0x135   : > { %v699_v11 = vpack.c.bf16 %v689_v9, %v688_v8 }
 0x136   : > { %v619_v12 = vpop.f32.mrf.mxu0 }
 0x137   : > { %v668_v13 = vpop.f32.mrf.mxu1  ;;  %803 = vmatmul.bf16.gmra.mxu2 %v699_v11  ;;  %v620_v16 = vadd.f32 %v1855_v10, %v619_v12 }
 0x139   : > { %v669_v20 = vadd.f32 %v668_v13, %v620_v16 }
 0x13b   : > { %v690_v24 = vmax.f32 %v669_v20, 0.0 }
 0x13e   : > { %v621_v18 = vpop.f32.mrf.mxu0 }
 0x13f   : > { %v670_v19 = vpop.f32.mrf.mxu1  ;;  %v622_v21 = vadd.f32 %v1855_v10, %v621_v18 }
 0x141   : > { %v671_v22 = vadd.f32 %v670_v19, %v622_v21 }
 0x143   : > { %v691_v25 = vmax.f32 %v671_v22, 0.0 }
 0x145   : > { %v700_v26 = vpack.c.bf16 %v691_v25, %v690_v24 }
 0x146   : > { %v624_v27 = vpop.f32.mrf.mxu0 }
 0x147   : > { %v673_v28 = vpop.f32.mrf.mxu1  ;;  %808 = vmatmul.bf16.gmra.mxu2 %v700_v26  ;;  %v625_v30 = vadd.f32 %v1855_v10, %v624_v27 }
 0x149   : > { %v674_v33 = vadd.f32 %v673_v28, %v625_v30 }
 0x14b   : > { %v692_v38 = vmax.f32 %v674_v33, 0.0 }
 0x14e   : > { %v626_v32 = vpop.f32.mrf.mxu0 }
 0x14f   : > { %v627_v34 = vadd.f32 %v1855_v10, %v626_v32  ;;  %v675_v35 = vpop.f32.mrf.mxu1 }
 0x151   : > { %v676_v37 = vadd.f32 %v675_v35, %v627_v34  ;;  %v1443_v35 = vld [vmem:[%s1939_s6] ss:$0 sm:$0xff] }
 0x153   : > { %v693_v39 = vmax.f32 %v676_v37, 0.0 }
 0x155   : > { %v701_v41 = vpack.c.bf16 %v693_v39, %v692_v38 }
 0x157   : > { %813 = vmatmul.bf16.gmra.mxu2 %v701_v41 }
 0x16a   : > { %v779_v42 = vpop.f32.mrf.mxu2 }
 0x16b   : > { %v780_v44 = vadd.f32 %v1442_v43, %v779_v42 }
 0x16d   : > { %v819_v47 = vmax.f32 %v780_v44, 0.0 }
 0x172   : > { %v781_v45 = vpop.f32.mrf.mxu2 }
 0x173   : > { %v782_v46 = vadd.f32 %v1442_v43, %v781_v45 }
 0x175   : > { %v820_v10 = vmax.f32 %v782_v46, 0.0 }
 0x177   : > { %v835_v48 = vpack.c.bf16 %v820_v10, %v819_v47 }
 0x179   : > { %919 = vmatmul.bf16.vlgmr.msra.gmra.mxu3 %v835_v48 }
 0x17a   : > { %v784_v49 = vpop.f32.mrf.mxu2 }
 0x17b   : > { %v785_v50 = vadd.f32 %v1442_v43, %v784_v49 }
 0x17d   : > { %v821_v53 = vmax.f32 %v785_v50, 0.0 }
 0x182   : > { %v786_v51 = vpop.f32.mrf.mxu2 }
 0x183   : > { %v787_v52 = vadd.f32 %v1442_v43, %v786_v51 }
 0x185   : > { %v822_v54 = vmax.f32 %v787_v52, 0.0 }
 0x187   : > { %v836_v55 = vpack.c.bf16 %v822_v54, %v821_v53 }
 0x189   : > { %924 = vmatmul.bf16.gmra.mxu3 %v836_v55 }
 0x18a   : > { %v789_v56 = vpop.f32.mrf.mxu2 }
 0x18b   : > { %v790_v57 = vadd.f32 %v1442_v43, %v789_v56 }
 0x18d   : > { %v823_v60 = vmax.f32 %v790_v57, 0.0 }
 0x192   : > { %v791_v58 = vpop.f32.mrf.mxu2 }
 0x193   : > { %v792_v59 = vadd.f32 %v1442_v43, %v791_v58 }
 0x195   : > { %v824_v61 = vmax.f32 %v792_v59, 0.0 }
 0x197   : > { %v837_v62 = vpack.c.bf16 %v824_v61, %v823_v60 }
 0x199   : > { %929 = vmatmul.bf16.gmra.mxu3 %v837_v62 }
 0x19a   : > { %v794_v63 = vpop.f32.mrf.mxu2 }
 0x19b   : > { %v795_v0 = vadd.f32 %v1442_v43, %v794_v63 }
 0x19d   : > { %v825_v3 = vmax.f32 %v795_v0, 0.0 }
 0x1a2   : > { %v796_v1 = vpop.f32.mrf.mxu2 }
 0x1a3   : > { %v797_v2 = vadd.f32 %v1442_v43, %v796_v1 }
 0x1a5   : > { %v826_v4 = vmax.f32 %v797_v2, 0.0 }
 0x1a7   : > { %v838_v5 = vpack.c.bf16 %v826_v4, %v825_v3 }
 0x1a9   : > { %934 = vmatmul.bf16.gmra.mxu3 %v838_v5 }
 0x1aa   : > { %v799_v6 = vpop.f32.mrf.mxu2 }
 0x1ab   : > { %v800_v7 = vadd.f32 %v1442_v43, %v799_v6 }
 0x1ad   : > { %v827_v11 = vmax.f32 %v800_v7, 0.0 }
 0x1b2   : > { %v801_v8 = vpop.f32.mrf.mxu2 }
 0x1b3   : > { %v802_v9 = vadd.f32 %v1442_v43, %v801_v8 }
 0x1b5   : > { %v828_v12 = vmax.f32 %v802_v9, 0.0 }
 0x1b7   : > { %v839_v13 = vpack.c.bf16 %v828_v12, %v827_v11 }
 0x1b9   : > { %939 = vmatmul.bf16.gmra.mxu3 %v839_v13 }
 0x1ba   : > { %v804_v14 = vpop.f32.mrf.mxu2 }
 0x1bb   : > { %v805_v15 = vadd.f32 %v1442_v43, %v804_v14 }
 0x1bd   : > { %v829_v18 = vmax.f32 %v805_v15, 0.0 }
 0x1c2   : > { %v806_v16 = vpop.f32.mrf.mxu2 }
 0x1c3   : > { %v807_v17 = vadd.f32 %v1442_v43, %v806_v16 }
 0x1c5   : > { %v830_v19 = vmax.f32 %v807_v17, 0.0 }
 0x1c7   : > { %v840_v20 = vpack.c.bf16 %v830_v19, %v829_v18 }
 0x1c9   : > { %944 = vmatmul.bf16.gmra.mxu3 %v840_v20 }
 0x1ca   : > { %v809_v21 = vpop.f32.mrf.mxu2 }
 0x1cb   : > { %v810_v22 = vadd.f32 %v1442_v43, %v809_v21 }
 0x1cd   : > { %v831_v25 = vmax.f32 %v810_v22, 0.0 }
 0x1d2   : > { %v811_v23 = vpop.f32.mrf.mxu2 }
 0x1d3   : > { %v812_v24 = vadd.f32 %v1442_v43, %v811_v23 }
 0x1d5   : > { %v832_v26 = vmax.f32 %v812_v24, 0.0 }
 0x1d7   : > { %v841_v27 = vpack.c.bf16 %v832_v26, %v831_v25 }
 0x1d9   : > { %949 = vmatmul.bf16.gmra.mxu3 %v841_v27 }
 0x1da   : > { %v814_v28 = vpop.f32.mrf.mxu2 }
 0x1db   : > { %v815_v29 = vadd.f32 %v1442_v43, %v814_v28 }
 0x1dd   : > { %v833_v32 = vmax.f32 %v815_v29, 0.0 }
 0x1e2   : > { %v816_v30 = vpop.f32.mrf.mxu2 }
 0x1e3   : > { %v817_v31 = vadd.f32 %v1442_v43, %v816_v30 }
 0x1e5   : > { %v834_v33 = vmax.f32 %v817_v31, 0.0 }
 0x1e7   : > { %v842_v34 = vpack.c.bf16 %v834_v33, %v833_v32 }
 0x1e9   : > { %954 = vmatmul.bf16.gmra.mxu3 %v842_v34 }
 0x1fc   : > { %v920_v36 = vpop.f32.mrf.mxu3 }
 0x1fd   : > { %v921_v37 = vadd.f32 %v1443_v35, %v920_v36 }
 0x1ff   : > { %960 = vst [vmem:[%s1881_s23] sm:$0xff] %v921_v37 }
 0x204   : > { %v922_v38 = vpop.f32.mrf.mxu3 }
 0x205   : > { %v923_v39 = vadd.f32 %v1443_v35, %v922_v38 }
 0x207   : > { %961 = vst [vmem:[%s1881_s23 + $0x8] sm:$0xff] %v923_v39 }
 0x20c   : > { %v925_v40 = vpop.f32.mrf.mxu3 }
 0x20d   : > { %v926_v41 = vadd.f32 %v1443_v35, %v925_v40 }
 0x20f   : > { %962 = vst [vmem:[%s1881_s23 + $0x10] sm:$0xff] %v926_v41 }
 0x214   : > { %v927_v42 = vpop.f32.mrf.mxu3 }
 0x215   : > { %v928_v43 = vadd.f32 %v1443_v35, %v927_v42 }
 0x217   : > { %963 = vst [vmem:[%s1881_s23 + $0x18] sm:$0xff] %v928_v43 }
 0x21c   : > { %v930_v44 = vpop.f32.mrf.mxu3 }
 0x21d   : > { %v931_v45 = vadd.f32 %v1443_v35, %v930_v44 }
 0x21f   : > { %964 = vst [vmem:[%s1881_s23 + $0x20] sm:$0xff] %v931_v45 }
 0x224   : > { %v932_v46 = vpop.f32.mrf.mxu3 }
 0x225   : > { %v933_v47 = vadd.f32 %v1443_v35, %v932_v46 }
 0x227   : > { %965 = vst [vmem:[%s1881_s23 + $0x28] sm:$0xff] %v933_v47 }
 0x22c   : > { %v935_v10 = vpop.f32.mrf.mxu3 }
 0x22d   : > { %v936_v48 = vadd.f32 %v1443_v35, %v935_v10 }
 0x22f   : > { %966 = vst [vmem:[%s1881_s23 + $0x30] sm:$0xff] %v936_v48 }
 0x234   : > { %v937_v49 = vpop.f32.mrf.mxu3 }
 0x235   : > { %v938_v50 = vadd.f32 %v1443_v35, %v937_v49 }
 0x237   : > { %967 = vst [vmem:[%s1881_s23 + $0x38] sm:$0xff] %v938_v50 }
 0x23c   : > { %v940_v51 = vpop.f32.mrf.mxu3 }
 0x23d   : > { %v941_v52 = vadd.f32 %v1443_v35, %v940_v51 }
 0x23f   : > { %968 = vst [vmem:[%s1881_s23 + $0x40] sm:$0xff] %v941_v52 }
 0x244   : > { %v942_v53 = vpop.f32.mrf.mxu3 }
 0x245   : > { %v943_v54 = vadd.f32 %v1443_v35, %v942_v53 }
 0x247   : > { %969 = vst [vmem:[%s1881_s23 + $0x48] sm:$0xff] %v943_v54 }
 0x24c   : > { %v945_v55 = vpop.f32.mrf.mxu3 }
 0x24d   : > { %v946_v56 = vadd.f32 %v1443_v35, %v945_v55 }
 0x24f   : > { %970 = vst [vmem:[%s1881_s23 + $0x50] sm:$0xff] %v946_v56 }
 0x254   : > { %v947_v57 = vpop.f32.mrf.mxu3 }
 0x255   : > { %v948_v58 = vadd.f32 %v1443_v35, %v947_v57 }
 0x257   : > { %971 = vst [vmem:[%s1881_s23 + $0x58] sm:$0xff] %v948_v58 }
 0x25c   : > { %v950_v59 = vpop.f32.mrf.mxu3 }
 0x25d   : > { %v951_v60 = vadd.f32 %v1443_v35, %v950_v59 }
 0x25f   : > { %972 = vst [vmem:[%s1881_s23 + $0x60] sm:$0xff] %v951_v60 }
 0x264   : > { %v952_v61 = vpop.f32.mrf.mxu3 }
 0x265   : > { %v953_v62 = vadd.f32 %v1443_v35, %v952_v61 }
 0x267   : > { %973 = vst [vmem:[%s1881_s23 + $0x68] sm:$0xff] %v953_v62 }
 0x26c   : > { %v955_v63 = vpop.f32.mrf.mxu3 }
 0x26d   : > { %v956_v0 = vadd.f32 %v1443_v35, %v955_v63 }
 0x26f   : > { %974 = vst [vmem:[%s1881_s23 + $0x70] sm:$0xff] %v956_v0 }
 0x274   : > { %v957_v1 = vpop.f32.mrf.mxu3 }
 0x275   : > { %v958_v2 = vadd.f32 %v1443_v35, %v957_v1 }
 0x277   : > { %975 = vst [vmem:[%s1881_s23 + $0x78] sm:$0xff] %v958_v2 }
 0x278   : > { %1591 = shalt.err (!%p1588_p10)
}
 0x279   : > { %s1647_s22 = smov 128   ;;  %s1648_s23 = smov 8  }
 0x27a   : > { %1372 = dma.vmem_to_hbm [thread:$0]  (%p1772_p7), %s990_s16, 2048, %s992_s1, %s977_s15, %s1647_s22, %s1647_s22, %s1648_s23  }
 0x27b PF: > { %s1006_s19 = sand.u32 1, %s1626_s24   ;;  %p1949_p12 = scmp.ge.s32.totalorder %s1638_s27, 2 }
 0x27c   : > { %s1007_s20 = scalar_lea.sflag [#allocation4], %s1006_s19 }
 0x27d   : > { %p1389_p13 = pnand %p1949_p12, %p1724_p6 }
 0x27f   : > { %p1390_p0 = pneg %p1389_p13 }
 0x281   : > { %1621 = dma.done.wait (%p1390_p0), %s1007_s20, 2048  }
 0x282   : > { %1623 = vsyncadd (%p1390_p0), %s1007_s20, 4294965248  ;;  %p22_p3 = scmp.ge.s32.totalorder %s1756_s11, 4   ;;  %s1950_s24 = smov %s1630_s25 }
 0x283   : > { %s1951_s25 = smov %s1634_s26  ;;  %s1952_s26 = smov %s1768_s17 }
 0x284   : > { %s1953_s27 = smov %s1756_s11  ;;  %24 = sbr.rel (!%p22_p3) target bundleno = 9 (0x9), region = 105 }
 0x289   :  { %1013 = vsyncpa [#allocation3], 1 }
 0x28a   :  { %1015 = vsyncpa [#allocation3 + $0x1], 1 }
 0x28b   :  { %1016 = vsyncpa [#allocation6], 1 }
 0x28c   :  { %1017 = vsyncpa [#allocation9], 1 }
 0x28d   :  { %1018 = vsyncpa [#allocation4], 1 }
 0x28e   :  { %1020 = vsyncpa [#allocation4 + $0x1], 1 }

</bundles_post_ra>
